<compile_context>
chip_gen: v6e
topology: v6e:2x2x1
jax: 0.10.0
libtpu: 0.0.40
codegen_flags: <defaults>
</compile_context>

<pallas_src>
import numpy as np
import jax
import jax.numpy as jnp
from jax.experimental import pallas as pl
from jax.experimental.pallas import tpu as pltpu

DIM = 16          # global `dim` in NN.py
STEP = 1.0        # global `step` in NN.py
LAYER_SIZES = (32, DIM * DIM)   # last layer must produce dim*dim
DROPOUT = 0.1     # inactive at inference (identity)
OUT = DIM - 4     # "valid" 5x5 conv output size

# central-difference coefficients: [1/12, -2/3, 0, 2/3, -1/12] / step
FD_COEFFS = (1.0 / 12.0 / STEP, -2.0 / 3.0 / STEP, 0.0,
             2.0 / 3.0 / STEP, -1.0 / 12.0 / STEP)


def _build_stencil_matrices():
    """Static banded matrices so that pred_flat @ S == finite-difference conv.

    pred_flat[b, r*DIM + s] = pred[b, r, s]
    f_x[b, i, j] = sum_v pred[b, i+2, j+v] * c[v]   (dx_kernel: row 2 nonzero)
    f_y[b, i, j] = sum_u pred[b, i+u, j+2] * c[u]   (dy_kernel: col 2 nonzero)
    """
    sx = np.zeros((DIM * DIM, OUT * OUT), np.float32)
    sy = np.zeros((DIM * DIM, OUT * OUT), np.float32)
    for i in range(OUT):
        for j in range(OUT):
            col = i * OUT + j
            for k, c in enumerate(FD_COEFFS):
                if c == 0.0:
                    continue
                sx[(i + 2) * DIM + (j + k), col] += c
                sy[(i + k) * DIM + (j + 2), col] += c
    return sx, sy


_SX_NP, _SY_NP = _build_stencil_matrices()


# ----------------------------------------------------------------------------
# Fused kernel: MLP + finite-difference stencils + channel L2 norm.
# All operands fit in VMEM; every matmul / output keeps >=128 lanes.
# ----------------------------------------------------------------------------
def fused_kernel(pc_ref, pts_ref, w1a_ref, w1b_ref, b1_ref, w2_ref, b2_ref,
                 sx_ref, sy_ref,
                 pred_ref, fx_ref, fy_ref, fn_ref):
    # h = ReLU([Pc_flat | pts] @ W1 + b1), with W1 pre-split to avoid the concat.
    h = (jnp.dot(pc_ref[...], w1a_ref[...], preferred_element_type=jnp.float32)
         + jnp.dot(pts_ref[...], w1b_ref[...], preferred_element_type=jnp.float32)
         + b1_ref[...])
    h = jnp.maximum(h, 0.0)
    # TODO(synk): nn.Dropout is identity in eval mode; training-mode dropout not implemented.

    pred = jnp.dot(h, w2_ref[...], preferred_element_type=jnp.float32) + b2_ref[...]
    pred_ref[...] = pred                                       # (B, 256) lane-dense

    # Finite-difference "convs" as lane-dense matmuls on the MXU.
    fx = jnp.dot(pred, sx_ref[...], preferred_element_type=jnp.float32)   # (B, 144)
    fy = jnp.dot(pred, sy_ref[...], preferred_element_type=jnp.float32)   # (B, 144)
    fx_ref[...] = fx
    fy_ref[...] = fy
    fn_ref[...] = jnp.sqrt(fx * fx + fy * fy)                  # ||[f_y, f_x]||_2 over channel


_VMEM_SPEC = pl.BlockSpec(memory_space=pltpu.MemorySpace.VMEM)


def init_params(key):
    """Deterministic PyTorch-Linear-style init (uniform +-1/sqrt(fan_in))."""
    in_features = DIM * DIM * 2 + 8
    params = []
    for out_features in LAYER_SIZES:
        key, kw, kb = jax.random.split(key, 3)
        bound = 1.0 / jnp.sqrt(jnp.float32(in_features))
        w = jax.random.uniform(kw, (in_features, out_features), jnp.float32,
                               minval=-bound, maxval=bound)
        b = jax.random.uniform(kb, (1, out_features), jnp.float32,
                               minval=-bound, maxval=bound)
        params.append((w, b))
        in_features = out_features
    return params


@jax.jit
def neural_net_forward(Pc, pts, w1a, w1b, b1, w2, b2, sx, sy):
    B = Pc.shape[0]
    pc_flat = Pc.reshape(B, -1)        # (B, 512)  -- NCHW flatten like torch .view
    pts_flat = pts.reshape(B, -1)      # (B, 8)

    feat_pc, feat_pts = pc_flat.shape[1], pts_flat.shape[1]
    hidden, npred, nout = LAYER_SIZES[0], DIM * DIM, OUT * OUT

    flops = 2 * B * (feat_pc * hidden + feat_pts * hidden
                     + hidden * npred + 2 * npred * nout)
    bytes_accessed = 4 * (B * (feat_pc + feat_pts)                       # activations in
                          + (feat_pc + feat_pts + 1) * hidden            # w1a/w1b/b1
                          + (hidden + 1) * npred                         # w2/b2
                          + 2 * npred * nout                             # stencils
                          + B * (npred + 3 * nout))                      # outputs

    pred_flat, fx_flat, fy_flat, fn_flat = pl.pallas_call(
        fused_kernel,
        out_shape=(
            jax.ShapeDtypeStruct((B, npred), jnp.float32),
            jax.ShapeDtypeStruct((B, nout), jnp.float32),
            jax.ShapeDtypeStruct((B, nout), jnp.float32),
            jax.ShapeDtypeStruct((B, nout), jnp.float32),
        ),
        in_specs=[_VMEM_SPEC] * 9,
        out_specs=(_VMEM_SPEC,) * 4,
        cost_estimate=pl.CostEstimate(
            flops=flops, transcendentals=B * nout, bytes_accessed=bytes_accessed),
    )(pc_flat, pts_flat, w1a, w1b, b1, w2, b2, sx, sy)

    # Reshape lane-dense kernel outputs to the torch output shapes (cheap, in XLA).
    pred = pred_flat.reshape(B, DIM, DIM)
    f_norm = fn_flat.reshape(B, OUT, OUT)
    f_x = fx_flat.reshape(B, 1, OUT, OUT)
    f_y = fy_flat.reshape(B, 1, OUT, OUT)
    # NOTE: like torch .squeeze(), this also drops the batch dim when B == 1.
    pred_sq = jnp.squeeze(pred)
    return pred_sq, f_norm, f_x, f_y


if __name__ == "__main__":
    key = jax.random.PRNGKey(0)
    kp, kpc, kpts = jax.random.split(key, 3)
    (w1, b1), (w2, b2) = init_params(kp)

    # Split the first-layer weight so the kernel never needs the (B, 520) concat.
    w1a = w1[:DIM * DIM * 2, :]        # (512, 32)
    w1b = w1[DIM * DIM * 2:, :]        # (8, 32)

    sx = jnp.asarray(_SX_NP)           # (256, 144) static FD stencil (d/dx)
    sy = jnp.asarray(_SY_NP)           # (256, 144) static FD stencil (d/dy)

    B = 2
    Pc = jax.random.normal(kpc, (B, 2, DIM, DIM), jnp.float32)   # dim*dim*2 features
    pts = jax.random.normal(kpts, (B, 8), jnp.float32)           # +8 features

    pred, f_norm, f_x, f_y = neural_net_forward(Pc, pts, w1a, w1b, b1, w2, b2, sx, sy)
    jax.block_until_ready((pred, f_norm, f_x, f_y))

    assert pred.shape == (B, DIM, DIM)
    assert f_norm.shape == (B, OUT, OUT)
    assert f_x.shape == (B, 1, OUT, OUT)
    assert f_y.shape == (B, 1, OUT, OUT)

    # Sanity-check the matmul-stencil FD against direct shifted-slice sums.
    pred_np = np.asarray(pred).reshape(B, DIM, DIM)
    fx_ref = np.zeros((B, OUT, OUT), np.float32)
    fy_ref = np.zeros((B, OUT, OUT), np.float32)
    for k, c in enumerate(FD_COEFFS):
        if c == 0.0:
            continue
        fx_ref += c * pred_np[:, 2:2 + OUT, k:k + OUT]
        fy_ref += c * pred_np[:, k:k + OUT, 2:2 + OUT]
    np.testing.assert_allclose(np.asarray(f_x)[:, 0], fx_ref, rtol=1e-5, atol=1e-5)
    np.testing.assert_allclose(np.asarray(f_y)[:, 0], fy_ref, rtol=1e-5, atol=1e-5)
    np.testing.assert_allclose(np.asarray(f_norm),
                               np.sqrt(fx_ref ** 2 + fy_ref ** 2), rtol=1e-5, atol=1e-5)

    print("KERNEL_OK")
</pallas_src>

<mosaic_0001>
module attributes {stable_mosaic.version = 11 : i64} {
  func.func @fused_kernel(%arg0: memref<2x512xf32, #tpu.memory_space<vmem>>, %arg1: memref<2x8xf32, #tpu.memory_space<vmem>>, %arg2: memref<512x32xf32, #tpu.memory_space<vmem>>, %arg3: memref<8x32xf32, #tpu.memory_space<vmem>>, %arg4: memref<1x32xf32, #tpu.memory_space<vmem>>, %arg5: memref<32x256xf32, #tpu.memory_space<vmem>>, %arg6: memref<1x256xf32, #tpu.memory_space<vmem>>, %arg7: memref<256x144xf32, #tpu.memory_space<vmem>>, %arg8: memref<256x144xf32, #tpu.memory_space<vmem>>, %arg9: memref<2x256xf32, #tpu.memory_space<vmem>>, %arg10: memref<2x144xf32, #tpu.memory_space<vmem>>, %arg11: memref<2x144xf32, #tpu.memory_space<vmem>>, %arg12: memref<2x144xf32, #tpu.memory_space<vmem>>) attributes {dimension_semantics = [], scalar_prefetch = 0 : i64, scratch_operands = 0 : i64, tpu.core_type = #tpu.core_type<tc>} {
    %c0 = arith.constant 0 : index
    %c0_0 = arith.constant 0 : index
    %0 = vector.load %arg0[%c0, %c0_0] : memref<2x512xf32, #tpu.memory_space<vmem>>, vector<2x512xf32>
    %c0_1 = arith.constant 0 : index
    %c0_2 = arith.constant 0 : index
    %1 = vector.load %arg2[%c0_1, %c0_2] : memref<512x32xf32, #tpu.memory_space<vmem>>, vector<512x32xf32>
    %cst = arith.constant dense<0.000000e+00> : vector<2x32xf32>
    %2 = tpu.matmul %0, %1, %cst {dimension_numbers = #tpu.dot_dimension_numbers<[1], [0], [0], [1], [0, 0, 1, 1], [], []>} : vector<2x512xf32>, vector<512x32xf32>, vector<2x32xf32> -> vector<2x32xf32>
    %c0_3 = arith.constant 0 : index
    %c0_4 = arith.constant 0 : index
    %3 = vector.load %arg1[%c0_3, %c0_4] : memref<2x8xf32, #tpu.memory_space<vmem>>, vector<2x8xf32>
    %c0_5 = arith.constant 0 : index
    %c0_6 = arith.constant 0 : index
    %4 = vector.load %arg3[%c0_5, %c0_6] : memref<8x32xf32, #tpu.memory_space<vmem>>, vector<8x32xf32>
    %cst_7 = arith.constant dense<0.000000e+00> : vector<2x32xf32>
    %5 = tpu.matmul %3, %4, %cst_7 {dimension_numbers = #tpu.dot_dimension_numbers<[1], [0], [0], [1], [0, 0, 1, 1], [], []>} : vector<2x8xf32>, vector<8x32xf32>, vector<2x32xf32> -> vector<2x32xf32>
    %6 = arith.addf %2, %5 : vector<2x32xf32>
    %c0_8 = arith.constant 0 : index
    %c0_9 = arith.constant 0 : index
    %7 = vector.load %arg4[%c0_8, %c0_9] : memref<1x32xf32, #tpu.memory_space<vmem>>, vector<1x32xf32>
    %8 = vector.broadcast %7 : vector<1x32xf32> to vector<2x32xf32>
    %9 = arith.addf %6, %8 : vector<2x32xf32>
    %cst_10 = arith.constant 0.000000e+00 : f32
    %10 = vector.broadcast %cst_10 : f32 to vector<2x32xf32>
    %11 = arith.maximumf %9, %10 : vector<2x32xf32>
    %c0_11 = arith.constant 0 : index
    %c0_12 = arith.constant 0 : index
    %12 = vector.load %arg5[%c0_11, %c0_12] : memref<32x256xf32, #tpu.memory_space<vmem>>, vector<32x256xf32>
    %cst_13 = arith.constant dense<0.000000e+00> : vector<2x256xf32>
    %13 = tpu.matmul %11, %12, %cst_13 {dimension_numbers = #tpu.dot_dimension_numbers<[1], [0], [0], [1], [0, 0, 1, 1], [], []>} : vector<2x32xf32>, vector<32x256xf32>, vector<2x256xf32> -> vector<2x256xf32>
    %c0_14 = arith.constant 0 : index
    %c0_15 = arith.constant 0 : index
    %14 = vector.load %arg6[%c0_14, %c0_15] : memref<1x256xf32, #tpu.memory_space<vmem>>, vector<1x256xf32>
    %15 = vector.broadcast %14 : vector<1x256xf32> to vector<2x256xf32>
    %16 = arith.addf %13, %15 : vector<2x256xf32>
    %c0_16 = arith.constant 0 : index
    %c0_17 = arith.constant 0 : index
    %17 = vector.load %arg9[%c0_16, %c0_17] : memref<2x256xf32, #tpu.memory_space<vmem>>, vector<2x256xf32>
    tpu.vector_store %arg9[%c0_16, %c0_17], %16 {strides = array<i32>} : memref<2x256xf32, #tpu.memory_space<vmem>>, vector<2x256xf32>,
    %c0_18 = arith.constant 0 : index
    %c0_19 = arith.constant 0 : index
    %18 = vector.load %arg7[%c0_18, %c0_19] : memref<256x144xf32, #tpu.memory_space<vmem>>, vector<256x144xf32>
    %cst_20 = arith.constant dense<0.000000e+00> : vector<2x144xf32>
    %19 = tpu.matmul %16, %18, %cst_20 {dimension_numbers = #tpu.dot_dimension_numbers<[1], [0], [0], [1], [0, 0, 1, 1], [], []>} : vector<2x256xf32>, vector<256x144xf32>, vector<2x144xf32> -> vector<2x144xf32>
    %c0_21 = arith.constant 0 : index
    %c0_22 = arith.constant 0 : index
    %20 = vector.load %arg8[%c0_21, %c0_22] : memref<256x144xf32, #tpu.memory_space<vmem>>, vector<256x144xf32>
    %cst_23 = arith.constant dense<0.000000e+00> : vector<2x144xf32>
    %21 = tpu.matmul %16, %20, %cst_23 {dimension_numbers = #tpu.dot_dimension_numbers<[1], [0], [0], [1], [0, 0, 1, 1], [], []>} : vector<2x256xf32>, vector<256x144xf32>, vector<2x144xf32> -> vector<2x144xf32>
    %c0_24 = arith.constant 0 : index
    %c0_25 = arith.constant 0 : index
    %22 = vector.load %arg10[%c0_24, %c0_25] : memref<2x144xf32, #tpu.memory_space<vmem>>, vector<2x144xf32>
    tpu.vector_store %arg10[%c0_24, %c0_25], %19 {strides = array<i32>} : memref<2x144xf32, #tpu.memory_space<vmem>>, vector<2x144xf32>,
    %c0_26 = arith.constant 0 : index
    %c0_27 = arith.constant 0 : index
    %23 = vector.load %arg11[%c0_26, %c0_27] : memref<2x144xf32, #tpu.memory_space<vmem>>, vector<2x144xf32>
    tpu.vector_store %arg11[%c0_26, %c0_27], %21 {strides = array<i32>} : memref<2x144xf32, #tpu.memory_space<vmem>>, vector<2x144xf32>,
    %24 = arith.mulf %19, %19 : vector<2x144xf32>
    %25 = arith.mulf %21, %21 : vector<2x144xf32>
    %26 = arith.addf %24, %25 : vector<2x144xf32>
    %27 = math.sqrt %26 : vector<2x144xf32>
    %c0_28 = arith.constant 0 : index
    %c0_29 = arith.constant 0 : index
    %28 = vector.load %arg12[%c0_28, %c0_29] : memref<2x144xf32, #tpu.memory_space<vmem>>, vector<2x144xf32>
    tpu.vector_store %arg12[%c0_28, %c0_29], %27 {strides = array<i32>} : memref<2x144xf32, #tpu.memory_space<vmem>>, vector<2x144xf32>,
    return
  }
}

</mosaic_0001>

<bundles_post_ra>
// kernel: neural_net_forward.1
= control target key start
LH: loop header
LB: loop body
LE: loop exit
PB: predicated region body
PF: predicated region fallthrough
CT: control target
= control target key end

     0   :  { %vm103_vm0 = vcmask 64512   ;;  %v889_v0 = vmov 0.0   ;;  %vm890_vm1 = vmmov 0   ;;  %v891_v33 = vmov 1983009808   ;;  %s1609_s3 = inlined_call_operand.vmem [shape: f32[8,32], index: 3, kind: input, shape index: {}]   ;;  %s1610_s2 = inlined_call_operand.vmem [shape: f32[512,32], index: 2, kind: input, shape index: {}]   ;;  %s1611_s1 = inlined_call_operand.vmem [shape: f32[2,8], index: 1, kind: input, shape index: {}]   ;;  %s1612_s0 = inlined_call_operand.vmem [shape: f32[2,512], index: 0, kind: input, shape index: {}]   ;;  %s1613_s5 = inlined_call_operand.vmem [shape: f32[32,256], index: 5, kind: input, shape index: {}]   ;;  %s1614_s7 = inlined_call_operand.vmem [shape: f32[256,144], index: 7, kind: input, shape index: {}]   ;;  %s1615_s8 = inlined_call_operand.vmem [shape: f32[256,144], index: 8, kind: input, shape index: {}]   ;;  %s1616_s4 = inlined_call_operand.vmem [shape: f32[1,32], index: 4, kind: input, shape index: {}]   ;;  %s1617_s6 = inlined_call_operand.vmem [shape: f32[1,256], index: 6, kind: input, shape index: {}]   ;;  %s1618_s9 = inlined_call_operand.vmem [shape: f32[2,256], index: 9, kind: output, shape index: {0}]   ;;  %s1619_s10 = inlined_call_operand.vmem [shape: f32[2,144], index: 10, kind: output, shape index: {1}]   ;;  %s1620_s11 = inlined_call_operand.vmem [shape: f32[2,144], index: 11, kind: output, shape index: {2}]   ;;  %s1621_s12 = inlined_call_operand.vmem [shape: f32[2,144], index: 12, kind: output, shape index: {3}]  }
   0x1   :  { %876 = vmatprep.subr.mxu0 %v889_v0  ;;  %v102_v1 = vld [vmem:[%s1609_s3] sm:$0xff]  ;;  %878 = vmatprep.mubr.msk.f32.mxu0 %vm890_vm1, %v889_v0  ;;  %v68_v2 = vld [vmem:[%s1610_s2 + $0xf8] sm:$0xff]  ;;  %v67_v6 = vld [vmem:[%s1610_s2 + $0xf0] sm:$0xff]  ;;  %v180_v34 = vunpack.c.l.s4 %v891_v33  ;;  %v182_v35 = vlaneseq  ;;  %vm368_vm2 = vcmask 261120   ;;  %vm736_vm3 = vcmask 1041408  }
   0x2   :  { %v101_v3 = vld [vmem:[%s1611_s1] sm:$0x3]  ;;  %877 = vmatpush3.msra.mxu0 %v102_v1  ;;  %806 = vmatprep.subr.mxu1 %v68_v2  ;;  %v52_v4 = vld [vmem:[%s1610_s2 + $0x78] sm:$0xff]  ;;  %v51_v8 = vld [vmem:[%s1610_s2 + $0x70] sm:$0xff]  ;;  %vm737_vm4 = vcmask 125954  }
   0x3   :  { %v100_v5 = vld [vmem:[%s1610_s2 + $0x1f8] sm:$0xff]  ;;  %879 = vmatmul.mubr.msk.f32.vlgmr.msra.gmra.mxu0 %vm103_vm0, %v101_v3  ;;  %807 = vmatpush3.msra.mxu1 %v52_v4  ;;  %v99_v9 = vld [vmem:[%s1610_s2 + $0x1f0] sm:$0xff]  ;;  %v66_v10 = vld [vmem:[%s1610_s2 + $0xe8] sm:$0xff]  ;;  %v181_v44 = vunpack.c.0.s8 %v180_v34  ;;  %v1079_v45 = vshrl.u32 %v182_v35, 7 }
   0x4   :  { %v84_v7 = vld [vmem:[%s1610_s2 + $0x178] sm:$0xff]  ;;  %841 = vmatprep.subr.mxu0 %v100_v5  ;;  %808 = vmatprep.subr.mxu1 %v67_v6  ;;  %v83_v11 = vld [vmem:[%s1610_s2 + $0x170] sm:$0xff]  ;;  %v50_v12 = vld [vmem:[%s1610_s2 + $0x68] sm:$0xff] }
   0x5   :  { %842 = vmatpush3.msra.mxu0 %v84_v7  ;;  %809 = vmatpush3.msra.mxu1 %v51_v8  ;;  %v98_v13 = vld [vmem:[%s1610_s2 + $0x1e8] sm:$0xff]  ;;  %v65_v14 = vld [vmem:[%s1610_s2 + $0xe0] sm:$0xff]  ;;  %v64_v18 = vld [vmem:[%s1610_s2 + $0xd8] sm:$0xff]  ;;  %v1109_v55 = vsub.s32 %v181_v44, %v1079_v45 }
   0x6   :  { %843 = vmatprep.subr.mxu0 %v99_v9  ;;  %810 = vmatprep.subr.mxu1 %v66_v10  ;;  %v82_v15 = vld [vmem:[%s1610_s2 + $0x168] sm:$0xff]  ;;  %v49_v16 = vld [vmem:[%s1610_s2 + $0x60] sm:$0xff]  ;;  %v48_v20 = vld [vmem:[%s1610_s2 + $0x58] sm:$0xff] }
   0x7   :  { %844 = vmatpush3.msra.mxu0 %v83_v11  ;;  %811 = vmatpush3.msra.mxu1 %v50_v12  ;;  %v97_v17 = vld [vmem:[%s1610_s2 + $0x1e0] sm:$0xff]  ;;  %v96_v21 = vld [vmem:[%s1610_s2 + $0x1d8] sm:$0xff]  ;;  %v63_v22 = vld [vmem:[%s1610_s2 + $0xd0] sm:$0xff] }
   0x8   :  { %845 = vmatprep.subr.mxu0 %v98_v13  ;;  %812 = vmatprep.subr.mxu1 %v65_v14  ;;  %v81_v19 = vld [vmem:[%s1610_s2 + $0x160] sm:$0xff]  ;;  %v80_v23 = vld [vmem:[%s1610_s2 + $0x158] sm:$0xff]  ;;  %v47_v24 = vld [vmem:[%s1610_s2 + $0x50] sm:$0xff] }
   0x9   :  { %846 = vmatpush3.msra.mxu0 %v82_v15  ;;  %813 = vmatpush3.msra.mxu1 %v49_v16  ;;  %v95_v25 = vld [vmem:[%s1610_s2 + $0x1d0] sm:$0xff]  ;;  %v62_v26 = vld [vmem:[%s1610_s2 + $0xc8] sm:$0xff]  ;;  %v61_v30 = vld [vmem:[%s1610_s2 + $0xc0] sm:$0xff] }
   0xa   :  { %847 = vmatprep.subr.mxu0 %v97_v17  ;;  %814 = vmatprep.subr.mxu1 %v64_v18  ;;  %v79_v27 = vld [vmem:[%s1610_s2 + $0x150] sm:$0xff]  ;;  %v46_v28 = vld [vmem:[%s1610_s2 + $0x48] sm:$0xff]  ;;  %v45_v32 = vld [vmem:[%s1610_s2 + $0x40] sm:$0xff] }
   0xb   :  { %848 = vmatpush3.msra.mxu0 %v81_v19  ;;  %815 = vmatpush3.msra.mxu1 %v48_v20  ;;  %v94_v29 = vld [vmem:[%s1610_s2 + $0x1c8] sm:$0xff]  ;;  %v93_v36 = vld [vmem:[%s1610_s2 + $0x1c0] sm:$0xff]  ;;  %v60_v37 = vld [vmem:[%s1610_s2 + $0xb8] sm:$0xff] }
   0xc   :  { %849 = vmatprep.subr.mxu0 %v96_v21  ;;  %816 = vmatprep.subr.mxu1 %v63_v22  ;;  %v78_v31 = vld [vmem:[%s1610_s2 + $0x148] sm:$0xff]  ;;  %v77_v38 = vld [vmem:[%s1610_s2 + $0x140] sm:$0xff]  ;;  %v44_v39 = vld [vmem:[%s1610_s2 + $0x38] sm:$0xff] }
   0xd   :  { %850 = vmatpush3.msra.mxu0 %v80_v23  ;;  %817 = vmatpush3.msra.mxu1 %v47_v24  ;;  %v92_v40 = vld [vmem:[%s1610_s2 + $0x1b8] sm:$0xff]  ;;  %v59_v41 = vld [vmem:[%s1610_s2 + $0xb0] sm:$0xff]  ;;  %v58_v47 = vld [vmem:[%s1610_s2 + $0xa8] sm:$0xff] }
   0xe   :  { %851 = vmatprep.subr.mxu0 %v95_v25  ;;  %818 = vmatprep.subr.mxu1 %v62_v26  ;;  %v76_v42 = vld [vmem:[%s1610_s2 + $0x138] sm:$0xff]  ;;  %v43_v43 = vld [vmem:[%s1610_s2 + $0x30] sm:$0xff]  ;;  %v42_v49 = vld [vmem:[%s1610_s2 + $0x28] sm:$0xff] }
   0xf   :  { %852 = vmatpush3.msra.mxu0 %v79_v27  ;;  %819 = vmatpush3.msra.mxu1 %v46_v28  ;;  %v91_v46 = vld [vmem:[%s1610_s2 + $0x1b0] sm:$0xff]  ;;  %v90_v50 = vld [vmem:[%s1610_s2 + $0x1a8] sm:$0xff]  ;;  %v57_v51 = vld [vmem:[%s1610_s2 + $0xa0] sm:$0xff] }
  0x10   :  { %853 = vmatprep.subr.mxu0 %v94_v29  ;;  %820 = vmatprep.subr.mxu1 %v61_v30  ;;  %v75_v48 = vld [vmem:[%s1610_s2 + $0x130] sm:$0xff]  ;;  %v74_v52 = vld [vmem:[%s1610_s2 + $0x128] sm:$0xff]  ;;  %v41_v53 = vld [vmem:[%s1610_s2 + $0x20] sm:$0xff] }
  0x11   :  { %854 = vmatpush3.msra.mxu0 %v78_v31  ;;  %821 = vmatpush3.msra.mxu1 %v45_v32  ;;  %v36_v54 = vld [vmem:[%s1612_s0] sm:$0xff]  ;;  %v56_v57 = vld [vmem:[%s1610_s2 + $0x98] sm:$0xff]  ;;  %v55_v62 = vld [vmem:[%s1610_s2 + $0x90] sm:$0xff] }
  0x12   :  { %855 = vmatprep.subr.mxu0 %v93_v36  ;;  %822 = vmatprep.subr.mxu1 %v60_v37  ;;  %v89_v56 = vld [vmem:[%s1610_s2 + $0x1a0] sm:$0xff]  ;;  %v40_v59 = vld [vmem:[%s1610_s2 + $0x18] sm:$0xff]  ;;  %v178_v60 = vcombine.high %v36_v54, %v36_v54  ;;  %v39_v1 = vld [vmem:[%s1610_s2 + $0x10] sm:$0xff]  ;;  %v185_v2 = vrot.slane %v36_v54, %v1109_v55 }
  0x13   :  { %856 = vmatpush3.msra.mxu0 %v77_v38  ;;  %823 = vmatpush3.msra.mxu1 %v44_v39  ;;  %v73_v58 = vld [vmem:[%s1610_s2 + $0x120] sm:$0xff]  ;;  %v88_v61 = vld [vmem:[%s1610_s2 + $0x198] sm:$0xff]  ;;  %v87_v3 = vld [vmem:[%s1610_s2 + $0x190] sm:$0xff] }
  0x14   :  { %857 = vmatprep.subr.mxu0 %v92_v40  ;;  %824 = vmatprep.subr.mxu1 %v59_v41  ;;  %v72_v63 = vld [vmem:[%s1610_s2 + $0x118] sm:$0xff]  ;;  %v54_v4 = vld [vmem:[%s1610_s2 + $0x88] sm:$0xff]  ;;  %v71_v5 = vld [vmem:[%s1610_s2 + $0x110] sm:$0xff]  ;;  %v192_v7 = vrot.slane %v178_v60, %v1109_v55  ;;  %v193_v12 = vcombine.high %v185_v2, %v185_v2 }
  0x15   :  { %858 = vmatpush3.msra.mxu0 %v76_v42  ;;  %825 = vmatpush3.msra.mxu1 %v43_v43  ;;  %v38_v6 = vld [vmem:[%s1610_s2 + $0x8] sm:$0xff]  ;;  %v53_v9 = vld [vmem:[%s1610_s2 + $0x80] sm:$0xff]  ;;  %v355_v16 = vld [vmem:[%s1613_s5 + $0x38] sm:$0xff] }
  0x16   :  { %859 = vmatprep.subr.mxu0 %v91_v46  ;;  %826 = vmatprep.subr.mxu1 %v58_v47  ;;  %v86_v8 = vld [vmem:[%s1610_s2 + $0x188] sm:$0xff]  ;;  %v37_v11 = vld [vmem:[%s1610_s2] sm:$0xff]  ;;  %v194_v15 = vcombine.high %v192_v7, %v192_v7  ;;  %v354_v17 = vld [vmem:[%s1613_s5 + $0x30] sm:$0xff] }
  0x17   :  { %860 = vmatpush3.msra.mxu0 %v75_v48  ;;  %827 = vmatpush3.msra.mxu1 %v42_v49  ;;  %v70_v10 = vld [vmem:[%s1610_s2 + $0x108] sm:$0xff]  ;;  %v85_v13 = vld [vmem:[%s1610_s2 + $0x180] sm:$0xff]  ;;  %v351_v19 = vld [vmem:[%s1613_s5 + $0x18] sm:$0xff] }
  0x18   :  { %861 = vmatprep.subr.mxu0 %v90_v50  ;;  %828 = vmatprep.subr.mxu1 %v57_v51  ;;  %v69_v14 = vld [vmem:[%s1610_s2 + $0x100] sm:$0xff]  ;;  %v353_v18 = vld [vmem:[%s1613_s5 + $0x28] sm:$0xff]  ;;  %v350_v20 = vld [vmem:[%s1613_s5 + $0x10] sm:$0xff] }
  0x19   :  { %862 = vmatpush3.msra.mxu0 %v74_v52  ;;  %829 = vmatpush3.msra.mxu1 %v41_v53  ;;  %v349_v21 = vld [vmem:[%s1613_s5 + $0x8] sm:$0xff]  ;;  %v348_v22 = vld [vmem:[%s1613_s5] sm:$0xff]  ;;  %v486_v23 = vld [vmem:[%s1614_s7 + $0xf8] sm:$0xff] }
  0x1a   :  { %863 = vmatprep.subr.mxu0 %v89_v56  ;;  %830 = vmatprep.subr.mxu1 %v56_v57  ;;  %v621_v24 = vld [vmem:[%s1615_s8 + $0xf8] sm:$0xff]  ;;  %v485_v25 = vld [vmem:[%s1614_s7 + $0xf0] sm:$0xff]  ;;  %v484_v26 = vld [vmem:[%s1614_s7 + $0xe8] sm:$0xff] }
  0x1b   :  { %864 = vmatpush3.msra.mxu0 %v73_v58  ;;  %831 = vmatpush3.msra.mxu1 %v40_v59  ;;  %v483_v27 = vld [vmem:[%s1614_s7 + $0xe0] sm:$0xff]  ;;  %v482_v28 = vld [vmem:[%s1614_s7 + $0xd8] sm:$0xff]  ;;  %v481_v29 = vld [vmem:[%s1614_s7 + $0xd0] sm:$0xff] }
  0x1c   :  { %865 = vmatprep.subr.mxu0 %v88_v61  ;;  %832 = vmatprep.subr.mxu1 %v55_v62  ;;  %v480_v30 = vld [vmem:[%s1614_s7 + $0xc8] sm:$0xff]  ;;  %v479_v31 = vld [vmem:[%s1614_s7 + $0xc0] sm:$0xff]  ;;  %v478_v32 = vld [vmem:[%s1614_s7 + $0xb8] sm:$0xff] }
  0x1d   :  { %866 = vmatpush3.msra.mxu0 %v72_v63  ;;  %833 = vmatpush3.msra.mxu1 %v39_v1  ;;  %v477_v33 = vld [vmem:[%s1614_s7 + $0xb0] sm:$0xff]  ;;  %v476_v34 = vld [vmem:[%s1614_s7 + $0xa8] sm:$0xff]  ;;  %v475_v35 = vld [vmem:[%s1614_s7 + $0xa0] sm:$0xff] }
  0x1e   :  { %867 = vmatprep.subr.mxu0 %v87_v3  ;;  %834 = vmatprep.subr.mxu1 %v54_v4  ;;  %v474_v36 = vld [vmem:[%s1614_s7 + $0x98] sm:$0xff]  ;;  %v473_v37 = vld [vmem:[%s1614_s7 + $0x90] sm:$0xff]  ;;  %v472_v38 = vld [vmem:[%s1614_s7 + $0x88] sm:$0xff] }
  0x1f   :  { %868 = vmatpush3.msra.mxu0 %v71_v5  ;;  %835 = vmatpush3.msra.mxu1 %v38_v6  ;;  %v471_v39 = vld [vmem:[%s1614_s7 + $0x80] sm:$0xff]  ;;  %v470_v40 = vld [vmem:[%s1614_s7 + $0x78] sm:$0xff]  ;;  %v469_v41 = vld [vmem:[%s1614_s7 + $0x70] sm:$0xff] }
  0x20   :  { %869 = vmatprep.subr.mxu0 %v86_v8  ;;  %836 = vmatprep.subr.mxu1 %v53_v9  ;;  %v468_v42 = vld [vmem:[%s1614_s7 + $0x68] sm:$0xff]  ;;  %v467_v43 = vld [vmem:[%s1614_s7 + $0x60] sm:$0xff]  ;;  %v466_v44 = vld [vmem:[%s1614_s7 + $0x58] sm:$0xff] }
  0x21   :  { %870 = vmatpush3.msra.mxu0 %v70_v10  ;;  %837 = vmatpush3.msra.mxu1 %v37_v11  ;;  %v465_v46 = vld [vmem:[%s1614_s7 + $0x50] sm:$0xff]  ;;  %v464_v47 = vld [vmem:[%s1614_s7 + $0x48] sm:$0xff]  ;;  %v463_v48 = vld [vmem:[%s1614_s7 + $0x40] sm:$0xff] }
  0x22   :  { %263 = vmatprep.mubr.f32.mxu1 %v193_v12  ;;  %871 = vmatprep.subr.mxu0 %v85_v13  ;;  %v462_v49 = vld [vmem:[%s1614_s7 + $0x38] sm:$0xff]  ;;  %v461_v50 = vld [vmem:[%s1614_s7 + $0x30] sm:$0xff]  ;;  %v460_v51 = vld [vmem:[%s1614_s7 + $0x28] sm:$0xff] }
  0x23   :  { %264 = vmatmul.mubr.f32.vlgmr.msra.gmra.mxu1 %v185_v2  ;;  %872 = vmatpush3.msra.mxu0 %v69_v14  ;;  %v459_v52 = vld [vmem:[%s1614_s7 + $0x20] sm:$0xff]  ;;  %v458_v53 = vld [vmem:[%s1614_s7 + $0x18] sm:$0xff]  ;;  %v457_v54 = vld [vmem:[%s1614_s7 + $0x10] sm:$0xff] }
  0x24   :  { %333 = vmatprep.mubr.f32.mxu0 %v194_v15  ;;  %436 = vmatprep.mubr.f32.mxu1 %v889_v0  ;;  %v352_v0 = vld [vmem:[%s1613_s5 + $0x20] sm:$0xff]  ;;  %v456_v56 = vld [vmem:[%s1614_s7 + $0x8] sm:$0xff]  ;;  %v518_v58 = vld [vmem:[%s1614_s7 + $0x1f8] sm:$0xff] }
  0x25   :  { %334 = vmatmul.mubr.f32.vlgmr.msra.gmra.mxu0 %v192_v7  ;;  %396 = vmatprep.subr.mxu1 %v355_v16  ;;  %v455_v57 = vld [vmem:[%s1614_s7] sm:$0xff]  ;;  %v517_v59 = vld [vmem:[%s1614_s7 + $0x1f0] sm:$0xff]  ;;  %v516_v60 = vld [vmem:[%s1614_s7 + $0x1e8] sm:$0xff] }
  0x26   :  { %397 = vmatpush1.msra.mxu1 %v354_v17  ;;  %519 = vmatprep.subr.mxu0 %v486_v23  ;;  %v515_v61 = vld [vmem:[%s1614_s7 + $0x1e0] sm:$0xff]  ;;  %v514_v62 = vld [vmem:[%s1614_s7 + $0x1d8] sm:$0xff]  ;;  %v513_v63 = vld [vmem:[%s1614_s7 + $0x1d0] sm:$0xff] }
  0x27   :  { %398 = vmatprep.subr.mxu1 %v353_v18  ;;  %520 = vmatpush1.msra.mxu0 %v485_v25  ;;  %v512_v1 = vld [vmem:[%s1614_s7 + $0x1c8] sm:$0xff]  ;;  %v511_v2 = vld [vmem:[%s1614_s7 + $0x1c0] sm:$0xff]  ;;  %v510_v3 = vld [vmem:[%s1614_s7 + $0x1b8] sm:$0xff] }
  0x28   :  { %399 = vmatpush1.msra.mxu1 %v352_v0  ;;  %521 = vmatprep.subr.mxu0 %v484_v26  ;;  %v509_v4 = vld [vmem:[%s1614_s7 + $0x1b0] sm:$0xff]  ;;  %v508_v5 = vld [vmem:[%s1614_s7 + $0x1a8] sm:$0xff]  ;;  %v507_v6 = vld [vmem:[%s1614_s7 + $0x1a0] sm:$0xff] }
  0x29   :  { %400 = vmatprep.subr.mxu1 %v351_v19  ;;  %522 = vmatpush1.msra.mxu0 %v483_v27  ;;  %v506_v7 = vld [vmem:[%s1614_s7 + $0x198] sm:$0xff]  ;;  %v505_v8 = vld [vmem:[%s1614_s7 + $0x190] sm:$0xff]  ;;  %v504_v9 = vld [vmem:[%s1614_s7 + $0x188] sm:$0xff] }
  0x2a   :  { %401 = vmatpush1.msra.mxu1 %v350_v20  ;;  %523 = vmatprep.subr.mxu0 %v482_v28  ;;  %v503_v10 = vld [vmem:[%s1614_s7 + $0x180] sm:$0xff]  ;;  %v502_v11 = vld [vmem:[%s1614_s7 + $0x178] sm:$0xff]  ;;  %v501_v12 = vld [vmem:[%s1614_s7 + $0x170] sm:$0xff] }
  0x2b   :  { %402 = vmatprep.subr.mxu1 %v349_v21  ;;  %524 = vmatpush1.msra.mxu0 %v481_v29  ;;  %v500_v13 = vld [vmem:[%s1614_s7 + $0x168] sm:$0xff]  ;;  %v499_v14 = vld [vmem:[%s1614_s7 + $0x160] sm:$0xff]  ;;  %v498_v15 = vld [vmem:[%s1614_s7 + $0x158] sm:$0xff] }
  0x2c   :  { %403 = vmatpush1.msra.mxu1 %v348_v22  ;;  %525 = vmatprep.subr.mxu0 %v480_v30  ;;  %v497_v16 = vld [vmem:[%s1614_s7 + $0x150] sm:$0xff]  ;;  %v496_v17 = vld [vmem:[%s1614_s7 + $0x148] sm:$0xff]  ;;  %v495_v18 = vld [vmem:[%s1614_s7 + $0x140] sm:$0xff] }
  0x2d   :  { %654 = vmatprep.subr.mxu1 %v621_v24  ;;  %526 = vmatpush1.msra.mxu0 %v479_v31  ;;  %v494_v0 = vld [vmem:[%s1614_s7 + $0x138] sm:$0xff]  ;;  %v493_v19 = vld [vmem:[%s1614_s7 + $0x130] sm:$0xff]  ;;  %v801_v29 = vld [vmem:[%s1616_s4] ss:$0 sm:$0xff] }
  0x2e   :  { %527 = vmatprep.subr.mxu0 %v478_v32  ;;  %vm1587_vm5 = vmor %vm737_vm4, %vm736_vm3 }
  0x2f   :  { %528 = vmatpush1.msra.mxu0 %v477_v33  ;;  %v620_v33 = vld [vmem:[%s1615_s8 + $0xf0] sm:$0xff] }
  0x30   :  { %529 = vmatprep.subr.mxu0 %v476_v34  ;;  %v619_v34 = vld [vmem:[%s1615_s8 + $0xe8] sm:$0xff] }
  0x31   :  { %530 = vmatpush1.msra.mxu0 %v475_v35  ;;  %v618_v35 = vld [vmem:[%s1615_s8 + $0xe0] sm:$0xff] }
  0x32   :  { %531 = vmatprep.subr.mxu0 %v474_v36  ;;  %v617_v36 = vld [vmem:[%s1615_s8 + $0xd8] sm:$0xff] }
  0x33   :  { %532 = vmatpush1.msra.mxu0 %v473_v37  ;;  %v616_v37 = vld [vmem:[%s1615_s8 + $0xd0] sm:$0xff] }
  0x34   :  { %533 = vmatprep.subr.mxu0 %v472_v38  ;;  %v615_v38 = vld [vmem:[%s1615_s8 + $0xc8] sm:$0xff] }
  0x35   :  { %534 = vmatpush1.msra.mxu0 %v471_v39  ;;  %v614_v39 = vld [vmem:[%s1615_s8 + $0xc0] sm:$0xff] }
  0x36   :  { %535 = vmatprep.subr.mxu0 %v470_v40  ;;  %v613_v40 = vld [vmem:[%s1615_s8 + $0xb8] sm:$0xff] }
  0x37   :  { %536 = vmatpush1.msra.mxu0 %v469_v41  ;;  %v612_v41 = vld [vmem:[%s1615_s8 + $0xb0] sm:$0xff] }
  0x38   :  { %537 = vmatprep.subr.mxu0 %v468_v42  ;;  %v611_v42 = vld [vmem:[%s1615_s8 + $0xa8] sm:$0xff] }
  0x39   :  { %538 = vmatpush1.msra.mxu0 %v467_v43  ;;  %v610_v43 = vld [vmem:[%s1615_s8 + $0xa0] sm:$0xff] }
  0x3a   :  { %539 = vmatprep.subr.mxu0 %v466_v44  ;;  %v609_v44 = vld [vmem:[%s1615_s8 + $0x98] sm:$0xff] }
  0x3b   :  { %540 = vmatpush1.msra.mxu0 %v465_v46  ;;  %v608_v46 = vld [vmem:[%s1615_s8 + $0x90] sm:$0xff] }
  0x3c   :  { %541 = vmatprep.subr.mxu0 %v464_v47  ;;  %v607_v47 = vld [vmem:[%s1615_s8 + $0x88] sm:$0xff] }
  0x3d   :  { %542 = vmatpush1.msra.mxu0 %v463_v48  ;;  %v606_v48 = vld [vmem:[%s1615_s8 + $0x80] sm:$0xff] }
  0x3e   :  { %543 = vmatprep.subr.mxu0 %v462_v49  ;;  %v605_v49 = vld [vmem:[%s1615_s8 + $0x78] sm:$0xff] }
  0x3f   :  { %544 = vmatpush1.msra.mxu0 %v461_v50  ;;  %v604_v50 = vld [vmem:[%s1615_s8 + $0x70] sm:$0xff] }
  0x40   :  { %545 = vmatprep.subr.mxu0 %v460_v51  ;;  %v603_v51 = vld [vmem:[%s1615_s8 + $0x68] sm:$0xff] }
  0x41   :  { %546 = vmatpush1.msra.mxu0 %v459_v52  ;;  %v602_v52 = vld [vmem:[%s1615_s8 + $0x60] sm:$0xff] }
  0x42   :  { %547 = vmatprep.subr.mxu0 %v458_v53  ;;  %v601_v53 = vld [vmem:[%s1615_s8 + $0x58] sm:$0xff] }
  0x43   :  { %548 = vmatpush1.msra.mxu0 %v457_v54  ;;  %v600_v54 = vld [vmem:[%s1615_s8 + $0x50] sm:$0xff] }
  0x44   :  { %549 = vmatprep.subr.mxu0 %v456_v56  ;;  %v599_v56 = vld [vmem:[%s1615_s8 + $0x48] sm:$0xff] }
  0x45   :  { %550 = vmatpush1.msra.mxu0 %v455_v57  ;;  %v598_v57 = vld [vmem:[%s1615_s8 + $0x40] sm:$0xff] }
  0x46   :  { %551 = vmatprep.subr.mxu0 %v518_v58  ;;  %v597_v58 = vld [vmem:[%s1615_s8 + $0x38] sm:$0xff] }
  0x47   :  { %552 = vmatpush2.msra.mxu0 %v517_v59  ;;  %v596_v59 = vld [vmem:[%s1615_s8 + $0x30] sm:$0xff] }
  0x48   :  { %553 = vmatprep.subr.mxu0 %v516_v60  ;;  %v595_v60 = vld [vmem:[%s1615_s8 + $0x28] sm:$0xff] }
  0x49   :  { %554 = vmatpush2.msra.mxu0 %v515_v61  ;;  %v594_v61 = vld [vmem:[%s1615_s8 + $0x20] sm:$0xff] }
  0x4a   :  { %555 = vmatprep.subr.mxu0 %v514_v62  ;;  %v593_v62 = vld [vmem:[%s1615_s8 + $0x18] sm:$0xff] }
  0x4b   :  { %556 = vmatpush2.msra.mxu0 %v513_v63  ;;  %v592_v63 = vld [vmem:[%s1615_s8 + $0x10] sm:$0xff] }
  0x4c   :  { %557 = vmatprep.subr.mxu0 %v512_v1  ;;  %v591_v1 = vld [vmem:[%s1615_s8 + $0x8] sm:$0xff] }
  0x4d   :  { %558 = vmatpush2.msra.mxu0 %v511_v2  ;;  %v590_v2 = vld [vmem:[%s1615_s8] sm:$0xff] }
  0x4e   :  { %559 = vmatprep.subr.mxu0 %v510_v3  ;;  %v653_v3 = vld [vmem:[%s1615_s8 + $0x1f8] sm:$0xff] }
  0x4f   :  { %560 = vmatpush2.msra.mxu0 %v509_v4  ;;  %v652_v4 = vld [vmem:[%s1615_s8 + $0x1f0] sm:$0xff] }
  0x50   :  { %561 = vmatprep.subr.mxu0 %v508_v5  ;;  %v651_v5 = vld [vmem:[%s1615_s8 + $0x1e8] sm:$0xff] }
  0x51   :  { %562 = vmatpush2.msra.mxu0 %v507_v6  ;;  %v650_v6 = vld [vmem:[%s1615_s8 + $0x1e0] sm:$0xff] }
  0x52   :  { %563 = vmatprep.subr.mxu0 %v506_v7  ;;  %v649_v7 = vld [vmem:[%s1615_s8 + $0x1d8] sm:$0xff] }
  0x53   :  { %564 = vmatpush2.msra.mxu0 %v505_v8  ;;  %v648_v8 = vld [vmem:[%s1615_s8 + $0x1d0] sm:$0xff] }
  0x54   :  { %565 = vmatprep.subr.mxu0 %v504_v9  ;;  %v647_v9 = vld [vmem:[%s1615_s8 + $0x1c8] sm:$0xff] }
  0x55   :  { %566 = vmatpush2.msra.mxu0 %v503_v10  ;;  %v646_v10 = vld [vmem:[%s1615_s8 + $0x1c0] sm:$0xff] }
  0x56   :  { %567 = vmatprep.subr.mxu0 %v502_v11  ;;  %v645_v11 = vld [vmem:[%s1615_s8 + $0x1b8] sm:$0xff] }
  0x57   :  { %568 = vmatpush2.msra.mxu0 %v501_v12  ;;  %v644_v12 = vld [vmem:[%s1615_s8 + $0x1b0] sm:$0xff] }
  0x58   :  { %569 = vmatprep.subr.mxu0 %v500_v13  ;;  %v643_v13 = vld [vmem:[%s1615_s8 + $0x1a8] sm:$0xff] }
  0x59   :  { %570 = vmatpush2.msra.mxu0 %v499_v14  ;;  %v642_v14 = vld [vmem:[%s1615_s8 + $0x1a0] sm:$0xff] }
  0x5a   :  { %571 = vmatprep.subr.mxu0 %v498_v15  ;;  %v641_v15 = vld [vmem:[%s1615_s8 + $0x198] sm:$0xff] }
  0x5b   :  { %572 = vmatpush2.msra.mxu0 %v497_v16  ;;  %v640_v16 = vld [vmem:[%s1615_s8 + $0x190] sm:$0xff] }
  0x5c   :  { %573 = vmatprep.subr.mxu0 %v496_v17  ;;  %v639_v17 = vld [vmem:[%s1615_s8 + $0x188] sm:$0xff] }
  0x5d   :  { %574 = vmatpush2.msra.mxu0 %v495_v18  ;;  %v638_v18 = vld [vmem:[%s1615_s8 + $0x180] sm:$0xff] }
  0x5e   :  { %575 = vmatprep.subr.mxu0 %v494_v0  ;;  %v637_v0 = vld [vmem:[%s1615_s8 + $0x178] sm:$0xff] }
  0x5f   :  { %576 = vmatpush2.msra.mxu0 %v493_v19  ;;  %v636_v19 = vld [vmem:[%s1615_s8 + $0x170] sm:$0xff] }
  0xc3   :  { %v173_v20 = vpop.f32.mrf.mxu0 }
  0xc5   :  { %v880_v21 = vpop.f32.mrf.mxu0 }
  0xc6   :  { %v634_v21 = vld [vmem:[%s1615_s8 + $0x160] sm:$0xff] }
  0xe3   :  { %v838_v22 = vpop.f32.mrf.mxu1 }
  0xe5   :  { %v873_v23 = vpop.f32.mrf.mxu0  ;;  %v839_v24 = vpop.f32.mrf.mxu1 }
  0xe6   :  { %v840_v25 = vadd.f32 %v839_v24, %v838_v22  ;;  %v633_v22 = vld [vmem:[%s1615_s8 + $0x158] sm:$0xff]  ;;  %v631_v24 = vld [vmem:[%s1615_s8 + $0x148] sm:$0xff] }
  0xe7   :  { %v874_v26 = vpop.f32.mrf.mxu0 }
  0xe8   :  { %v266_v27 = vadd.f32 %v840_v25, %v173_v20  ;;  %v875_v28 = vadd.f32 %v874_v26, %v873_v23  ;;  %v635_v20 = vld [vmem:[%s1615_s8 + $0x168] sm:$0xff]  ;;  %v632_v23 = vld [vmem:[%s1615_s8 + $0x150] sm:$0xff]  ;;  %v630_v25 = vld [vmem:[%s1615_s8 + $0x140] sm:$0xff] }
  0xe9   :  { %v629_v26 = vld [vmem:[%s1615_s8 + $0x138] sm:$0xff] }
  0xea   :  { %v336_v30 = vadd.f32 %v875_v28, %v266_v27  ;;  %v628_v27 = vld [vmem:[%s1615_s8 + $0x130] sm:$0xff]  ;;  %v492_v28 = vld [vmem:[%s1614_s7 + $0x128] sm:$0xff] }
  0xeb   :  { %577 = vmatprep.subr.mxu0 %v492_v28 }
  0xec   :  { %v346_v31 = vadd.f32 %v801_v29, %v336_v30  ;;  %v627_v29 = vld [vmem:[%s1615_s8 + $0x128] sm:$0xff]  ;;  %v491_v30 = vld [vmem:[%s1614_s7 + $0x120] sm:$0xff] }
  0xed   :  { %578 = vmatpush2.msra.mxu0 %v491_v30 }
  0xee   :  { %v347_v32 = vmax.f32 %v346_v31, 0.0  ;;  %v626_v31 = vld [vmem:[%s1615_s8 + $0x120] sm:$0xff] }
  0xf0   :  { %802 = vmatmul.mubr.msk.f32.vlgmr.msra.gmra.mxu1 %vm368_vm2, %v347_v32  ;;  %v490_v32 = vld [vmem:[%s1614_s7 + $0x118] sm:$0xff] }
  0xf1   :  { %655 = vmatpush1.msra.mxu1 %v620_v33  ;;  %v625_v33 = vld [vmem:[%s1615_s8 + $0x118] sm:$0xff]  ;;  %579 = vmatprep.subr.mxu0 %v490_v32 }
  0xf2   :  { %656 = vmatprep.subr.mxu1 %v619_v34  ;;  %v489_v34 = vld [vmem:[%s1614_s7 + $0x110] sm:$0xff] }
  0xf3   :  { %657 = vmatpush1.msra.mxu1 %v618_v35  ;;  %v624_v35 = vld [vmem:[%s1615_s8 + $0x110] sm:$0xff]  ;;  %580 = vmatpush2.msra.mxu0 %v489_v34 }
  0xf4   :  { %658 = vmatprep.subr.mxu1 %v617_v36  ;;  %v488_v36 = vld [vmem:[%s1614_s7 + $0x108] sm:$0xff] }
  0xf5   :  { %659 = vmatpush1.msra.mxu1 %v616_v37  ;;  %v623_v37 = vld [vmem:[%s1615_s8 + $0x108] sm:$0xff]  ;;  %581 = vmatprep.subr.mxu0 %v488_v36 }
  0xf6   :  { %660 = vmatprep.subr.mxu1 %v615_v38  ;;  %v487_v38 = vld [vmem:[%s1614_s7 + $0x100] sm:$0xff] }
  0xf7   :  { %661 = vmatpush1.msra.mxu1 %v614_v39  ;;  %v622_v39 = vld [vmem:[%s1615_s8 + $0x100] sm:$0xff]  ;;  %582 = vmatpush2.msra.mxu0 %v487_v38 }
  0xf8   :  { %662 = vmatprep.subr.mxu1 %v613_v40  ;;  %v360_v40 = vsub.s32 0, %v1079_v45 }
  0xf9   :  { %663 = vmatpush1.msra.mxu1 %v612_v41  ;;  %v364_v41 = vsub.s32 1, %v1079_v45 }
  0xfa   :  { %664 = vmatprep.subr.mxu1 %v611_v42  ;;  %v356_v42 = vld [vmem:[%s1617_s6] sm:$0x3] }
  0xfb   :  { %665 = vmatpush1.msra.mxu1 %v610_v43  ;;  %v361_v43 = vrot.slane %v356_v42, %v360_v40 }
  0xfc   :  { %666 = vmatprep.subr.mxu1 %v609_v44  ;;  %v365_v44 = vrot.slane %v356_v42, %v364_v41 }
  0xfd   :  { %667 = vmatpush1.msra.mxu1 %v608_v46 }
  0xfe   :  { %668 = vmatprep.subr.mxu1 %v607_v47 }
  0xff   :  { %669 = vmatpush1.msra.mxu1 %v606_v48 }
 0x100   :  { %670 = vmatprep.subr.mxu1 %v605_v49 }
 0x101   :  { %671 = vmatpush1.msra.mxu1 %v604_v50 }
 0x102   :  { %672 = vmatprep.subr.mxu1 %v603_v51 }
 0x103   :  { %673 = vmatpush1.msra.mxu1 %v602_v52 }
 0x104   :  { %674 = vmatprep.subr.mxu1 %v601_v53 }
 0x105   :  { %675 = vmatpush1.msra.mxu1 %v600_v54 }
 0x106   :  { %676 = vmatprep.subr.mxu1 %v599_v56 }
 0x107   :  { %677 = vmatpush1.msra.mxu1 %v598_v57 }
 0x108   :  { %678 = vmatprep.subr.mxu1 %v597_v58 }
 0x109   :  { %679 = vmatpush1.msra.mxu1 %v596_v59 }
 0x10a   :  { %680 = vmatprep.subr.mxu1 %v595_v60 }
 0x10b   :  { %681 = vmatpush1.msra.mxu1 %v594_v61 }
 0x10c   :  { %682 = vmatprep.subr.mxu1 %v593_v62 }
 0x10d   :  { %683 = vmatpush1.msra.mxu1 %v592_v63 }
 0x10e   :  { %684 = vmatprep.subr.mxu1 %v591_v1 }
 0x10f   :  { %685 = vmatpush1.msra.mxu1 %v590_v2 }
 0x110   :  { %686 = vmatprep.subr.mxu1 %v653_v3 }
 0x111   :  { %687 = vmatpush2.msra.mxu1 %v652_v4 }
 0x112   :  { %688 = vmatprep.subr.mxu1 %v651_v5 }
 0x113   :  { %689 = vmatpush2.msra.mxu1 %v650_v6 }
 0x114   :  { %690 = vmatprep.subr.mxu1 %v649_v7 }
 0x115   :  { %691 = vmatpush2.msra.mxu1 %v648_v8 }
 0x116   :  { %692 = vmatprep.subr.mxu1 %v647_v9 }
 0x117   :  { %693 = vmatpush2.msra.mxu1 %v646_v10 }
 0x118   :  { %694 = vmatprep.subr.mxu1 %v645_v11 }
 0x119   :  { %695 = vmatpush2.msra.mxu1 %v644_v12 }
 0x11a   :  { %696 = vmatprep.subr.mxu1 %v643_v13 }
 0x11b   :  { %697 = vmatpush2.msra.mxu1 %v642_v14 }
 0x11c   :  { %698 = vmatprep.subr.mxu1 %v641_v15 }
 0x11d   :  { %699 = vmatpush2.msra.mxu1 %v640_v16 }
 0x11e   :  { %700 = vmatprep.subr.mxu1 %v639_v17 }
 0x11f   :  { %701 = vmatpush2.msra.mxu1 %v638_v18 }
 0x120   :  { %702 = vmatprep.subr.mxu1 %v637_v0 }
 0x121   :  { %703 = vmatpush2.msra.mxu1 %v636_v19 }
 0x122   :  { %704 = vmatprep.subr.mxu1 %v635_v20 }
 0x123   :  { %705 = vmatpush2.msra.mxu1 %v634_v21 }
 0x124   :  { %706 = vmatprep.subr.mxu1 %v633_v22 }
 0x125   :  { %707 = vmatpush2.msra.mxu1 %v632_v23 }
 0x126   :  { %708 = vmatprep.subr.mxu1 %v631_v24 }
 0x127   :  { %709 = vmatpush2.msra.mxu1 %v630_v25 }
 0x128   :  { %710 = vmatprep.subr.mxu1 %v629_v26 }
 0x129   :  { %711 = vmatpush2.msra.mxu1 %v628_v27 }
 0x12a   :  { %712 = vmatprep.subr.mxu1 %v627_v29 }
 0x12b   :  { %713 = vmatpush2.msra.mxu1 %v626_v31 }
 0x12c   :  { %714 = vmatprep.subr.mxu1 %v625_v33 }
 0x12d   :  { %715 = vmatpush2.msra.mxu1 %v624_v35 }
 0x12e   :  { %716 = vmatprep.subr.mxu1 %v623_v37 }
 0x12f   :  { %717 = vmatpush2.msra.mxu1 %v622_v39 }
 0x1b0   :  { %v438_v46 = vpop.f32.mrf.mxu1 }
 0x1b1   :  { %v439_v48 = vadd.f32 %v438_v46, %v361_v43 }
 0x1b2   :  { %v440_v47 = vpop.f32.mrf.mxu1 }
 0x1b3   :  { %v441_v49 = vadd.f32 %v440_v47, %v365_v44 }
 0x1b5   :  { %v445_v50 = vcombine.low %v439_v48, %v441_v49  ;;  %583 = vmatprep.mubr.f32.mxu0 %v441_v49  ;;  %718 = vmatprep.mubr.f32.mxu1 %v441_v49 }
 0x1b6   :  { %584 = vmatmul.mubr.f32.vlgmr.msra.gmra.mxu0 %v439_v48  ;;  %719 = vmatmul.mubr.f32.vlgmr.msra.gmra.mxu1 %v439_v48 }
 0x1b7   :  { %803 = vst.sshfl [vmem:[%s1618_s9] sm:$0x33 pattern:$0x76325410] %v445_v50 }
 0x276   :  { %v585_v45 = vpop.f32.mrf.mxu0  ;;  %v720_v51 = vpop.f32.mrf.mxu1 }
 0x277   :  { %v752_v52 = vmul.f32 %v585_v45, %v585_v45  ;;  %v754_v53 = vmul.f32 %v720_v51, %v720_v51 }
 0x278   :  { %v587_v54 = vpop.f32.mrf.mxu0  ;;  %v722_v56 = vpop.f32.mrf.mxu1 }
 0x279   :  { %v756_v57 = vadd.f32 %v754_v53, %v752_v52  ;;  %v727_v58 = vcombine.low %v585_v45, %v587_v54  ;;  %v753_v59 = vmul.f32 %v587_v54, %v587_v54  ;;  %v742_v60 = vcombine.low %v720_v51, %v722_v56 }
 0x27a   :  { %v755_v61 = vmul.f32 %v722_v56, %v722_v56 }
 0x27b   :  { %885 = vrsqrt.f32 %v756_v57  ;;  %v734_v63 = vrot.slane %v727_v58, %v1109_v55  ;;  %v749_v1 = vrot.slane %v742_v60, %v1109_v55  ;;  %vm760_vm6 = vcmp.eq.f32.partialorder %v756_v57, inf }
 0x27c   :  { %v757_v2 = vadd.f32 %v755_v61, %v753_v59  ;;  %v763_v8 = vand.u32 2147483648, %v756_v57  ;;  %vm762_vm8 = vcmp.eq.f32.partialorder %v756_v57, 0.0 }
 0x27d   :  { %739 = vst.msk [vmem:[%s1619_s10] sm:$0xf] %vm1587_vm5, %v734_v63  ;;  %751 = vst.msk [vmem:[%s1620_s11] sm:$0xf] %vm1587_vm5, %v749_v1 }
 0x27e   :  { %887 = vrsqrt.f32 %v757_v2  ;;  %vm767_vm7 = vcmp.eq.f32.partialorder %v757_v2, inf  ;;  %v770_v9 = vand.u32 2147483648, %v757_v2  ;;  %vm769_vm9 = vcmp.eq.f32.partialorder %v757_v2, 0.0 }
 0x288   :  { %v886_v3 = vpop.eup %885 }
 0x289   :  { %v759_v4 = vmul.f32 %v886_v3, %v756_v57 }
 0x28b   :  { %v888_v5 = vpop.eup %887  ;;  %v761_v6 = vsel %vm760_vm6, %v756_v57, %v759_v4 }
 0x28c   :  { %v766_v7 = vmul.f32 %v888_v5, %v757_v2  ;;  %v764_v11 = vsel %vm762_vm8, %v763_v8, %v761_v6 }
 0x28e   :  { %v768_v10 = vsel %vm767_vm7, %v757_v2, %v766_v7 }
 0x28f   :  { %v771_v12 = vsel %vm769_vm9, %v770_v9, %v768_v10 }
 0x290   :  { %v774_v13 = vcombine.low %v764_v11, %v771_v12 }
 0x292   :  { %v781_v14 = vrot.slane %v774_v13, %v1109_v55 }
 0x294   :  { %783 = vst.msk [vmem:[%s1621_s12] sm:$0xf] %vm1587_vm5, %v781_v14 }

</bundles_post_ra>
